<compile_context>
chip_gen: v6e
topology: v6e:2x2x1
jax: 0.10.0
libtpu: 0.0.40
codegen_flags: <defaults>
</compile_context>

<pallas_src>
import functools

import jax
import jax.numpy as jnp
from jax.experimental import pallas as pl
from jax.experimental.pallas import tpu as pltpu

LANE = 128
SUBLANE = 8


def _round_up(n: int, m: int) -> int:
    return ((n + m - 1) // m) * m


def mlp_kernel(x_ref, w1_ref, b1_ref, w2_ref, b2_ref, o_ref):
    # fc1: [TB, D] (bf16) @ [D, Hp] (bf16) -> f32 accumulate, f32 bias + ReLU.
    h = jnp.dot(x_ref[...], w1_ref[...], preferred_element_type=jnp.float32)
    h = jnp.maximum(h + b1_ref[...], 0.0)
    # fc2: cast activation to bf16 for the MXU, accumulate in f32.
    out = jnp.dot(h.astype(w2_ref.dtype), w2_ref[...],
                  preferred_element_type=jnp.float32)
    o_ref[...] = (out + b2_ref[...]).astype(o_ref.dtype)


def make_params(key, input_size, class_nums, hidden=50):
    """PyTorch-like nn.Linear init: uniform(-1/sqrt(fan_in), 1/sqrt(fan_in)), f32, unpadded."""
    k1, k2, k3, k4 = jax.random.split(key, 4)
    bound1 = 1.0 / (input_size ** 0.5)
    bound2 = 1.0 / (hidden ** 0.5)
    # Weights stored as [in, out] (transpose of PyTorch's [out, in]).
    w1 = jax.random.uniform(k1, (input_size, hidden), jnp.float32, -bound1, bound1)
    b1 = jax.random.uniform(k2, (hidden,), jnp.float32, -bound1, bound1)
    w2 = jax.random.uniform(k3, (hidden, class_nums), jnp.float32, -bound2, bound2)
    b2 = jax.random.uniform(k4, (class_nums,), jnp.float32, -bound2, bound2)
    return w1, b1, w2, b2


def prepare_params(w1, b1, w2, b2):
    """Pad hidden/class dims up to the 128-lane width and cast matmul weights to bf16."""
    d_in, hidden = w1.shape
    class_nums = w2.shape[1]
    hp = _round_up(hidden, LANE)
    cp = _round_up(class_nums, LANE)
    w1p = jnp.zeros((d_in, hp), jnp.bfloat16).at[:, :hidden].set(w1.astype(jnp.bfloat16))
    b1p = jnp.zeros((1, hp), jnp.float32).at[0, :hidden].set(b1)
    w2p = jnp.zeros((hp, cp), jnp.bfloat16).at[:hidden, :class_nums].set(w2.astype(jnp.bfloat16))
    b2p = jnp.zeros((1, cp), jnp.float32).at[0, :class_nums].set(b2)
    return w1p, b1p, w2p, b2p


@functools.partial(jax.jit, static_argnames=("class_nums", "block_b"))
def linear_model_forward(x, w1p, b1p, w2p, b2p, class_nums, *, block_b=256):
    """x: [B, D_in] f32. Padded params from prepare_params. Returns [B, class_nums] f32."""
    B, D = x.shape
    Hp = w1p.shape[1]
    Cp = w2p.shape[1]

    # Batch tile: multiple of 8 sublanes; keep tile modest so it fits v7x's smaller VMEM.
    TB = min(block_b, _round_up(B, SUBLANE))
    B_pad = _round_up(B, TB)
    if B_pad != B:
        x = jnp.pad(x, ((0, B_pad - B), (0, 0)))
    xb = x.astype(jnp.bfloat16)

    flops = 2 * B_pad * (D * Hp + Hp * Cp)
    bytes_accessed = (xb.size * 2 + w1p.size * 2 + w2p.size * 2
                      + b1p.size * 4 + b2p.size * 4 + B_pad * Cp * 4)
    cost = pl.CostEstimate(flops=flops, transcendentals=0,
                           bytes_accessed=bytes_accessed)

    out_shape = jax.ShapeDtypeStruct((B_pad, Cp), jnp.float32)
    grid_b = B_pad // TB

    if grid_b == 1:
        # Single block: no grid, no pipeline scaffolding, everything VMEM-resident.
        out = pl.pallas_call(
            mlp_kernel,
            out_shape=out_shape,
            in_specs=[pl.BlockSpec(memory_space=pltpu.MemorySpace.VMEM)] * 5,
            out_specs=pl.BlockSpec(memory_space=pltpu.MemorySpace.VMEM),
            cost_estimate=cost,
        )(xb, w1p, b1p, w2p, b2p)
    else:
        # Batch-tiled: x/out stream per tile, weights & biases stay resident (constant index).
        out = pl.pallas_call(
            mlp_kernel,
            out_shape=out_shape,
            grid=(grid_b,),
            in_specs=[
                pl.BlockSpec((TB, D), lambda i: (i, 0)),
                pl.BlockSpec((D, Hp), lambda i: (0, 0)),
                pl.BlockSpec((1, Hp), lambda i: (0, 0)),
                pl.BlockSpec((Hp, Cp), lambda i: (0, 0)),
                pl.BlockSpec((1, Cp), lambda i: (0, 0)),
            ],
            out_specs=pl.BlockSpec((TB, Cp), lambda i: (i, 0)),
            compiler_params=pltpu.CompilerParams(
                dimension_semantics=("parallel",)),
            cost_estimate=cost,
        )(xb, w1p, b1p, w2p, b2p)

    return out[:B, :class_nums]


def reference_forward_f32(x, w1, b1, w2, b2):
    h = jnp.maximum(x @ w1 + b1, 0.0)
    return h @ w2 + b2


def reference_forward_bf16(x, w1p, b1p, w2p, b2p, class_nums):
    xb = x.astype(jnp.bfloat16)
    h = jnp.dot(xb, w1p, preferred_element_type=jnp.float32) + b1p
    h = jnp.maximum(h, 0.0)
    out = jnp.dot(h.astype(jnp.bfloat16), w2p,
                  preferred_element_type=jnp.float32) + b2p
    return out[:, :class_nums]


if __name__ == "__main__":
    key = jax.random.PRNGKey(0)
    kx, kp, kx2 = jax.random.split(key, 3)

    input_size, class_nums, hidden = 32, 10, 50
    raw_params = make_params(kp, input_size, class_nums, hidden)
    padded_params = prepare_params(*raw_params)

    # --- Small batch: exercises the grid-less single-block path. ---
    B = 8
    x = jax.random.normal(kx, (B, input_size), jnp.float32)
    out = jax.block_until_ready(
        linear_model_forward(x, *padded_params, class_nums=class_nums))
    assert out.shape == (B, class_nums)

    ref_bf16 = reference_forward_bf16(x, *padded_params, class_nums)
    ref_f32 = reference_forward_f32(x, *raw_params)
    assert jnp.allclose(out, ref_bf16, atol=1e-2, rtol=1e-2)
    assert jnp.allclose(out, ref_f32, atol=5e-2, rtol=5e-2)

    # --- Larger batch: exercises the batch-tiled "parallel" grid path. ---
    B2 = 512
    x2 = jax.random.normal(kx2, (B2, input_size), jnp.float32)
    out2 = jax.block_until_ready(
        linear_model_forward(x2, *padded_params, class_nums=class_nums, block_b=256))
    assert out2.shape == (B2, class_nums)
    ref2 = reference_forward_f32(x2, *raw_params)
    assert jnp.allclose(out2, ref2, atol=5e-2, rtol=5e-2)

    print("KERNEL_OK")
</pallas_src>

<mosaic_0001>
module attributes {stable_mosaic.version = 11 : i64} {
  func.func @mlp_kernel(%arg0: memref<8x32xbf16, #tpu.memory_space<vmem>>, %arg1: memref<32x128xbf16, #tpu.memory_space<vmem>>, %arg2: memref<1x128xf32, #tpu.memory_space<vmem>>, %arg3: memref<128x128xbf16, #tpu.memory_space<vmem>>, %arg4: memref<1x128xf32, #tpu.memory_space<vmem>>, %arg5: memref<8x128xf32, #tpu.memory_space<vmem>>) attributes {dimension_semantics = [], scalar_prefetch = 0 : i64, scratch_operands = 0 : i64, tpu.core_type = #tpu.core_type<tc>} {
    %c0 = arith.constant 0 : index
    %c0_0 = arith.constant 0 : index
    %0 = vector.load %arg0[%c0, %c0_0] : memref<8x32xbf16, #tpu.memory_space<vmem>>, vector<8x32xbf16>
    %c0_1 = arith.constant 0 : index
    %c0_2 = arith.constant 0 : index
    %1 = vector.load %arg1[%c0_1, %c0_2] : memref<32x128xbf16, #tpu.memory_space<vmem>>, vector<32x128xbf16>
    %cst = arith.constant dense<0.000000e+00> : vector<8x128xf32>
    %2 = tpu.matmul %0, %1, %cst {dimension_numbers = #tpu.dot_dimension_numbers<[1], [0], [0], [1], [0, 0, 1, 1], [], []>} : vector<8x32xbf16>, vector<32x128xbf16>, vector<8x128xf32> -> vector<8x128xf32>
    %c0_3 = arith.constant 0 : index
    %c0_4 = arith.constant 0 : index
    %3 = vector.load %arg2[%c0_3, %c0_4] : memref<1x128xf32, #tpu.memory_space<vmem>>, vector<1x128xf32>
    %4 = vector.broadcast %3 : vector<1x128xf32> to vector<8x128xf32>
    %5 = arith.addf %2, %4 : vector<8x128xf32>
    %cst_5 = arith.constant 0.000000e+00 : f32
    %6 = vector.broadcast %cst_5 : f32 to vector<8x128xf32>
    %7 = arith.maximumf %5, %6 : vector<8x128xf32>
    %8 = arith.truncf %7 : vector<8x128xf32> to vector<8x128xbf16>
    %c0_6 = arith.constant 0 : index
    %c0_7 = arith.constant 0 : index
    %9 = vector.load %arg3[%c0_6, %c0_7] : memref<128x128xbf16, #tpu.memory_space<vmem>>, vector<128x128xbf16>
    %cst_8 = arith.constant dense<0.000000e+00> : vector<8x128xf32>
    %10 = tpu.matmul %8, %9, %cst_8 {dimension_numbers = #tpu.dot_dimension_numbers<[1], [0], [0], [1], [0, 0, 1, 1], [], []>} : vector<8x128xbf16>, vector<128x128xbf16>, vector<8x128xf32> -> vector<8x128xf32>
    %c0_9 = arith.constant 0 : index
    %c0_10 = arith.constant 0 : index
    %11 = vector.load %arg4[%c0_9, %c0_10] : memref<1x128xf32, #tpu.memory_space<vmem>>, vector<1x128xf32>
    %12 = vector.broadcast %11 : vector<1x128xf32> to vector<8x128xf32>
    %13 = arith.addf %10, %12 : vector<8x128xf32>
    %c0_11 = arith.constant 0 : index
    %c0_12 = arith.constant 0 : index
    %14 = vector.load %arg5[%c0_11, %c0_12] : memref<8x128xf32, #tpu.memory_space<vmem>>, vector<8x128xf32>
    tpu.vector_store %arg5[%c0_11, %c0_12], %13 {strides = array<i32>} : memref<8x128xf32, #tpu.memory_space<vmem>>, vector<8x128xf32>,
    return
  }
}

</mosaic_0001>

<bundles_post_ra>
// kernel: linear_model_forward.1
= control target key start
LH: loop header
LB: loop body
LE: loop exit
PB: predicated region body
PF: predicated region fallthrough
CT: control target
= control target key end

     0   :  { %10 = vsyncpa [#allocation3], 0  ;;  %s439_s0 = inlined_call_operand.vmem [shape: bf16[8,32], index: 0, kind: input, shape index: {}]   ;;  %s440_s1 = inlined_call_operand.hbm [shape: bf16[32,128], index: 1, kind: input, shape index: {}]   ;;  %s441_s2 = inlined_call_operand.vmem [shape: f32[1,128], index: 2, kind: input, shape index: {}]   ;;  %s442_s3 = inlined_call_operand.hbm [shape: bf16[128,128], index: 3, kind: input, shape index: {}]   ;;  %s443_s4 = inlined_call_operand.vmem [shape: f32[1,128], index: 4, kind: input, shape index: {}]   ;;  %s444_s5 = inlined_call_operand.hbm [shape: f32[8,128], index: 5, kind: output, shape index: {}]  }
   0x1   :  { %11 = vsyncpa [#allocation6], 0 }
   0x2   :  { %12 = vsyncpa [#allocation4], 0  ;;  %s384_s18 = smov [#allocation2]  }
   0x3   :  { %s20_s19 = sshll.u32 %s384_s18, 4  ;;  %s21_s19 = int_to_ptr.vmem [resolvable:$true] %s20_s19 }
   0x4   :  { %s326_s20 = scalar_lea.vmem %s21_s19, 256  ;;  %p331_p1 = scmp.lt.s32.totalorder %s21_s19, %s21_s19 }
   0x5   :  { %p327_p0 = scmp.ne.s32.totalorder %s21_s19, %s326_s20  ;;  %p332_p2 = scmp.lt.s32.totalorder %s326_s20, %s326_s20 }
   0x7   :  { %p333_p3 = por %p332_p2, %p331_p1 }
   0x9   :  { %p334_p4 = pnand %p333_p3, %p327_p0 }
   0xb   :  { %337 = shalt.err (!%p334_p4)
}
   0xc   :  { %s385_s21 = smov 64   ;;  %s386_s22 = smov 4  }
   0xd   :  { %26 = dma.hbm_to_vmem [thread:$0]  %s440_s1, 256, %s21_s19, [#allocation3], %s385_s21, %s385_s21, %s386_s22  }
   0xe   :  { %s387_s25 = smov [#allocation5]  }
   0xf   :  { %s34_s26 = sshll.u32 %s387_s25, 4  ;;  %s35_s26 = int_to_ptr.vmem [resolvable:$true] %s34_s26 }
  0x10   :  { %s346_s27 = scalar_lea.vmem %s35_s26, 1024  ;;  %p351_p6 = scmp.lt.s32.totalorder %s35_s26, %s35_s26 }
  0x11   :  { %p347_p5 = scmp.ne.s32.totalorder %s35_s26, %s346_s27  ;;  %p352_p7 = scmp.lt.s32.totalorder %s346_s27, %s346_s27 }
  0x13   :  { %p353_p8 = por %p352_p7, %p351_p6 }
  0x15   :  { %p354_p9 = pnand %p353_p8, %p347_p5 }
  0x17   :  { %357 = shalt.err (!%p354_p9)
}
  0x18   :  { %40 = dma.hbm_to_vmem [thread:$0]  %s442_s3, 1024, %s35_s26, [#allocation6], %s385_s21, %s385_s21, %s386_s22  }
  0x19   :  { %378 = dma.done.wait [#allocation3], 256  }
  0x1a   :  { %379 = vsyncadd [#allocation3], 4294967040 }
  0x1b   :  { %380 = dma.done.wait [#allocation6], 1024  }
  0x1c   :  { %381 = vsyncadd [#allocation6], 4294966272  ;;  %v388_v0 = vmov 0.0   ;;  %vm389_vm0 = vmmov 0   ;;  %v308_v1 = vld [vmem:[#allocation2 + $0x8] sm:$0xff]   ;;  %v309_v2 = vld [vmem:[#allocation2] sm:$0xff]  }
  0x1d   :  { %273 = vmatprep.subr.bf16.mxu0 %v388_v0  ;;  %277 = vmatprep.mubr.msk.bf16.mxu0 %vm389_vm0, %v388_v0  ;;  %v310_v3 = vld [vmem:[#allocation5 + $0x38] sm:$0xff]   ;;  %vm74_vm1 = vcmask 261120   ;;  %v311_v4 = vld [vmem:[#allocation5 + $0x30] sm:$0xff]   ;;  %v312_v6 = vld [vmem:[#allocation5 + $0x28] sm:$0xff]   ;;  %s390_s8 = smov [#allocation7]  }
  0x1e   :  { %281 = vmatprep.subr.bf16.mxu1 %v388_v0  ;;  %297 = vmatprep.mubr.msk.bf16.mxu1 %vm389_vm0, %v388_v0  ;;  %v50_v5 = vld [vmem:[%s439_s0] sm:$0xf]  ;;  %v313_v7 = vld [vmem:[#allocation5 + $0x20] sm:$0xff]   ;;  %v314_v8 = vld [vmem:[#allocation5 + $0x18] sm:$0xff]   ;;  %s238_s9 = sshll.u32 %s390_s8, 4  ;;  %s239_s9 = int_to_ptr.vmem [resolvable:$true] %s238_s9 }
  0x1f   :  { %274 = vmatpush3.bf16.msra.mxu0 %v308_v1  ;;  %282 = vmatpush3.bf16.msra.mxu1 %v310_v3  ;;  %v315_v9 = vld [vmem:[#allocation5 + $0x10] sm:$0xff]   ;;  %v316_v10 = vld [vmem:[#allocation5 + $0x8] sm:$0xff]   ;;  %v317_v11 = vld [vmem:[#allocation5] sm:$0xff]   ;;  %p363_p11 = scmp.lt.s32.totalorder %s239_s9, %s239_s9 }
  0x20   :  { %275 = vmatprep.subr.bf16.mxu0 %v388_v0  ;;  %283 = vmatprep.subr.bf16.mxu1 %v388_v0  ;;  %v248_v12 = vld [vmem:[%s441_s2] ss:$0 sm:$0xff]  ;;  %s358_s2 = scalar_lea.vmem %s239_s9, 128 }
  0x21   :  { %v252_v20 = vld [vmem:[%s443_s4] ss:$0 sm:$0xff]  ;;  %p359_p10 = scmp.ne.s32.totalorder %s239_s9, %s358_s2  ;;  %p364_p12 = scmp.lt.s32.totalorder %s358_s2, %s358_s2 }
  0x23   :  { %276 = vmatpush3.bf16.msra.mxu0 %v309_v2  ;;  %284 = vmatpush3.bf16.msra.mxu1 %v311_v4  ;;  %p365_p13 = por %p364_p12, %p363_p11 }
  0x24   :  { %285 = vmatprep.subr.bf16.mxu1 %v388_v0 }
  0x25   :  { %p366_p0 = pnand %p365_p13, %p359_p10 }
  0x26   :  { %278 = vmatmul.mubr.msk.bf16.vlgmr.msra.gmra.mxu0 %vm74_vm1, %v50_v5 }
  0x27   :  { %286 = vmatpush3.bf16.msra.mxu1 %v312_v6 }
  0x28   :  { %287 = vmatprep.subr.bf16.mxu1 %v388_v0 }
  0x2b   :  { %288 = vmatpush3.bf16.msra.mxu1 %v313_v7 }
  0x2c   :  { %289 = vmatprep.subr.bf16.mxu1 %v388_v0 }
  0x2f   :  { %290 = vmatpush3.bf16.msra.mxu1 %v314_v8 }
  0x30   :  { %291 = vmatprep.subr.bf16.mxu1 %v388_v0 }
  0x33   :  { %292 = vmatpush3.bf16.msra.mxu1 %v315_v9 }
  0x34   :  { %293 = vmatprep.subr.bf16.mxu1 %v388_v0 }
  0x37   :  { %294 = vmatpush3.bf16.msra.mxu1 %v316_v10 }
  0x38   :  { %295 = vmatprep.subr.bf16.mxu1 %v388_v0 }
  0x3b   :  { %296 = vmatpush3.bf16.msra.mxu1 %v317_v11 }
  0xe6   :  { %v112_v13 = vpop.f32.mrf.mxu0 }
  0xe7   :  { %v113_v14 = vadd.f32 %v248_v12, %v112_v13 }
  0xe8   :  { %v279_v15 = vpop.f32.mrf.mxu0 }
  0xe9   :  { %v118_v16 = vmax.f32 %v113_v14, 0.0 }
  0xea   :  { %v115_v17 = vpop.f32.mrf.mxu0 }
  0xeb   :  { %v119_v18 = vpack.c.bf16 %v118_v16, %v118_v16 }
  0xec   :  { %v280_v19 = vpop.f32.mrf.mxu0 }
  0xed   :  { %298 = vmatmul.mubr.bf16.vlgmr.msra.gmra.mxu1 %v119_v18 }
 0x1ad   :  { %v225_v21 = vpop.f32.mrf.mxu1 }
 0x1ae   :  { %v226_v22 = vadd.f32 %v252_v20, %v225_v21 }
 0x1af   :  { %v299_v23 = vpop.f32.mrf.mxu1 }
 0x1b0   :  { %231 = vst [vmem:[#allocation7] sm:$0xff] %v226_v22 }
 0x1b1   :  { %v228_v24 = vpop.f32.mrf.mxu1 }
 0x1b2   :  { %369 = shalt.err (!%p366_p0)
}
 0x1b3   :  { %241 = dma.vmem_to_hbm [thread:$0]  %s239_s9, 128, %s444_s5, [#allocation4]   ;;  %v300_v25 = vpop.f32.mrf.mxu1 }
 0x1b4   :  { %382 = dma.done.wait [#allocation4], 128  }
 0x1b5   :  { %383 = vsyncadd [#allocation4], 4294967168 }
 0x1b6   :  { %245 = vsyncpa [#allocation3], 1 }
 0x1b7   :  { %246 = vsyncpa [#allocation6], 1 }
 0x1b8   :  { %247 = vsyncpa [#allocation4], 1 }

</bundles_post_ra>
